<compile_context>
chip_gen: v5e
topology: v5e:2x2
jax: 0.10.0
libtpu: 0.0.40
codegen_flags: <defaults>
</compile_context>

<pallas_src>
import functools

import jax
import jax.numpy as jnp
from jax.experimental import pallas as pl
from jax.experimental.pallas import tpu as pltpu


def _round_up(x, m):
    return (x + m - 1) // m * m


# ---------------- in-kernel elementwise helpers ----------------

def _softplus(x):
    # branch-free; matches torch.nn.Softplus(beta=1, threshold=20) to fp32 tolerance
    return jnp.maximum(x, 0.0) + jnp.log1p(jnp.exp(-jnp.abs(x)))


def _sigmoid(x):
    # single EUP transcendental instead of exp + reciprocal
    return 0.5 * (jnp.tanh(0.5 * x) + 1.0)


# ---------------- Pallas kernels ----------------

def dlgm_binary_kernel(z_ref, w1_ref, b1_ref, w2_ref, b2_ref, out_ref):
    h = _softplus(jnp.dot(z_ref[...], w1_ref[...],
                          preferred_element_type=jnp.float32) + b1_ref[...])
    y = jnp.dot(h.astype(w2_ref.dtype), w2_ref[...],
                preferred_element_type=jnp.float32) + b2_ref[...]
    out_ref[...] = _sigmoid(y)


def dlgm_nonbinary_kernel(z_ref, w1_ref, b1_ref, w2_ref, b2_ref, out_ref, *, out_pad):
    h = _softplus(jnp.dot(z_ref[...], w1_ref[...],
                          preferred_element_type=jnp.float32) + b1_ref[...])
    # single fused head matmul: columns [0:out_pad) = loc logits, [out_pad:) = scale pre-act
    y = jnp.dot(h.astype(w2_ref.dtype), w2_ref[...],
                preferred_element_type=jnp.float32) + b2_ref[...]
    out_ref[:, :out_pad] = _sigmoid(y[:, :out_pad])
    out_ref[:, out_pad:] = _softplus(y[:, out_pad:])


# ---------------- wrapper ----------------

def dlgm_forward(z, params, binary, *, batch_tile=1024, compute_dtype=jnp.float32):
    """params: torch-convention weights W (out, in) and biases b (out,).

    compute_dtype=jnp.bfloat16 halves matmul-input DMA bytes (MXU is bf16-native);
    epilogue math and outputs stay f32 either way.
    """
    B, z_dim = z.shape
    hidden = params["w1"].shape[0]
    out_dim = params["w21"].shape[0]
    out_pad = _round_up(out_dim, 128)          # lane-dense head width

    # pre-transpose (out,in) -> (in,out); zero-pad head columns to 128-multiple
    w1t = params["w1"].T.astype(compute_dtype)
    b1 = params["b1"][None, :].astype(jnp.float32)

    def pad_head(w, b):
        wt = jnp.zeros((hidden, out_pad), compute_dtype).at[:, :out_dim].set(
            w.T.astype(compute_dtype))
        bp = jnp.zeros((1, out_pad), jnp.float32).at[:, :out_dim].set(
            b.astype(jnp.float32))
        return wt, bp

    w21t, b21 = pad_head(params["w21"], params["b21"])
    if binary:
        w2, b2 = w21t, b21
        out_width = out_pad
        kernel = dlgm_binary_kernel
    else:
        w22t, b22 = pad_head(params["w22"], params["b22"])
        # fuse both heads into one (hidden, 2*out_pad) MXU pass + one output slab
        w2 = jnp.concatenate([w21t, w22t], axis=1)
        b2 = jnp.concatenate([b21, b22], axis=1)
        out_width = 2 * out_pad
        kernel = functools.partial(dlgm_nonbinary_kernel, out_pad=out_pad)

    # batch tiling: grid over batch, weights stay resident (constant index_map)
    tb = min(batch_tile, _round_up(B, 8))
    b_pad = _round_up(B, tb)
    z_p = z.astype(compute_dtype)
    if b_pad != B:
        z_p = jnp.pad(z_p, ((0, b_pad - B), (0, 0)))

    out = pl.pallas_call(
        kernel,
        out_shape=jax.ShapeDtypeStruct((b_pad, out_width), jnp.float32),
        grid=(b_pad // tb,),
        in_specs=[
            pl.BlockSpec((tb, z_dim), lambda i: (i, 0)),       # z: batch-tiled
            pl.BlockSpec(w1t.shape, lambda i: (0, 0)),          # weights: resident
            pl.BlockSpec(b1.shape, lambda i: (0, 0)),
            pl.BlockSpec(w2.shape, lambda i: (0, 0)),
            pl.BlockSpec(b2.shape, lambda i: (0, 0)),
        ],
        out_specs=pl.BlockSpec((tb, out_width), lambda i: (i, 0)),
        compiler_params=pltpu.CompilerParams(
            dimension_semantics=("parallel",),
            vmem_limit_bytes=64 * 1024 * 1024,
        ),
    )(z_p, w1t, b1, w2, b2)

    if binary:
        return out[:B, :out_dim]
    return out[:B, :out_dim], out[:B, out_pad:out_pad + out_dim]


# ---------------- reference (pure JAX) ----------------

def dlgm_ref(z, params, binary):
    h = jax.nn.softplus(z @ params["w1"].T + params["b1"])
    loc = jax.nn.sigmoid(h @ params["w21"].T + params["b21"])
    if binary:
        return loc
    scale = jax.nn.softplus(h @ params["w22"].T + params["b22"])
    return (loc, scale)


# ---------------- param init (deterministic, torch-Linear-like shapes) ----------------

def init_params(key, input_dim, z_dim, hidden_dim, binary):
    ks = jax.random.split(key, 6)
    out21 = input_dim if binary else input_dim - 1
    p = {
        "w1": jax.random.normal(ks[0], (hidden_dim, z_dim), jnp.float32) * 0.1,
        "b1": jax.random.normal(ks[1], (hidden_dim,), jnp.float32) * 0.1,
        "w21": jax.random.normal(ks[2], (out21, hidden_dim), jnp.float32) * 0.1,
        "b21": jax.random.normal(ks[3], (out21,), jnp.float32) * 0.1,
    }
    if not binary:
        p["w22"] = jax.random.normal(ks[4], (input_dim - 1, hidden_dim), jnp.float32) * 0.1
        p["b22"] = jax.random.normal(ks[5], (input_dim - 1,), jnp.float32) * 0.1
    return p


if __name__ == "__main__":
    key = jax.random.PRNGKey(0)
    B, input_dim, z_dim, hidden_dim = 8, 129, 8, 32

    kz, kp = jax.random.split(key)
    z = jax.random.normal(kz, (B, z_dim), jnp.float32)

    # non-binary case: returns (loc_img, scale_img)
    params_nb = init_params(kp, input_dim, z_dim, hidden_dim, binary=False)
    loc, scale = dlgm_forward(z, params_nb, binary=False)
    jax.block_until_ready((loc, scale))
    loc_r, scale_r = dlgm_ref(z, params_nb, binary=False)
    assert loc.shape == loc_r.shape and scale.shape == scale_r.shape
    # tanh-form sigmoid / branch-free softplus are equal to the exact forms to ~fp32;
    # 1e-4 absolute keeps margin for EUP approximation differences.
    assert jnp.allclose(loc, loc_r, atol=1e-4), "loc mismatch"
    assert jnp.allclose(scale, scale_r, atol=1e-4), "scale mismatch"

    # binary case: returns loc_img only
    params_b = init_params(kp, input_dim, z_dim, hidden_dim, binary=True)
    loc_b = dlgm_forward(z, params_b, binary=True)
    jax.block_until_ready(loc_b)
    loc_b_r = dlgm_ref(z, params_b, binary=True)
    assert loc_b.shape == loc_b_r.shape
    assert jnp.allclose(loc_b, loc_b_r, atol=1e-4), "binary loc mismatch"

    print("KERNEL_OK")
</pallas_src>

<mosaic_0001>
module attributes {stable_mosaic.version = 11 : i64} {
  func.func @dlgm_nonbinary_kernel(%arg0: i32, %arg1: memref<8x8xf32, #tpu.memory_space<vmem>>, %arg2: memref<8x32xf32, #tpu.memory_space<vmem>>, %arg3: memref<1x32xf32, #tpu.memory_space<vmem>>, %arg4: memref<32x256xf32, #tpu.memory_space<vmem>>, %arg5: memref<1x256xf32, #tpu.memory_space<vmem>>, %arg6: memref<8x256xf32, #tpu.memory_space<vmem>>) attributes {dimension_semantics = [#tpu.dimension_semantics<parallel>], iteration_bounds = array<i64: 1>, scalar_prefetch = 0 : i64, scratch_operands = 0 : i64, tpu.core_type = #tpu.core_type<tc>, window_params = [{transform_indices = @transform_0, window_bounds = array<i64: 8, 8>}, {pipeline_mode = #tpu.pipeline_mode<synchronous>, transform_indices = @transform_1, window_bounds = array<i64: 8, 32>}, {pipeline_mode = #tpu.pipeline_mode<synchronous>, transform_indices = @transform_2, window_bounds = array<i64: 1, 32>}, {pipeline_mode = #tpu.pipeline_mode<synchronous>, transform_indices = @transform_3, window_bounds = array<i64: 32, 256>}, {pipeline_mode = #tpu.pipeline_mode<synchronous>, transform_indices = @transform_4, window_bounds = array<i64: 1, 256>}, {transform_indices = @transform_5, window_bounds = array<i64: 8, 256>}]} {
    %c0 = arith.constant 0 : index
    %c0_0 = arith.constant 0 : index
    %0 = vector.load %arg1[%c0, %c0_0] : memref<8x8xf32, #tpu.memory_space<vmem>>, vector<8x8xf32>
    %c0_1 = arith.constant 0 : index
    %c0_2 = arith.constant 0 : index
    %1 = vector.load %arg2[%c0_1, %c0_2] : memref<8x32xf32, #tpu.memory_space<vmem>>, vector<8x32xf32>
    %cst = arith.constant dense<0.000000e+00> : vector<8x32xf32>
    %2 = tpu.matmul %0, %1, %cst {dimension_numbers = #tpu.dot_dimension_numbers<[1], [0], [0], [1], [0, 0, 1, 1], [], []>} : vector<8x8xf32>, vector<8x32xf32>, vector<8x32xf32> -> vector<8x32xf32>
    %c0_3 = arith.constant 0 : index
    %c0_4 = arith.constant 0 : index
    %3 = vector.load %arg3[%c0_3, %c0_4] : memref<1x32xf32, #tpu.memory_space<vmem>>, vector<1x32xf32>
    %4 = vector.broadcast %3 : vector<1x32xf32> to vector<8x32xf32>
    %5 = arith.addf %2, %4 : vector<8x32xf32>
    %cst_5 = arith.constant 0.000000e+00 : f32
    %6 = vector.broadcast %cst_5 : f32 to vector<8x32xf32>
    %7 = arith.maximumf %5, %6 : vector<8x32xf32>
    %8 = math.absf %5 : vector<8x32xf32>
    %cst_6 = arith.constant 0.000000e+00 : f32
    %9 = vector.broadcast %cst_6 : f32 to vector<8x32xf32>
    %10 = arith.subf %9, %8 : vector<8x32xf32>
    %11 = math.exp %10 : vector<8x32xf32>
    %12 = math.log1p %11 : vector<8x32xf32>
    %13 = arith.addf %7, %12 : vector<8x32xf32>
    %c0_7 = arith.constant 0 : index
    %c0_8 = arith.constant 0 : index
    %14 = vector.load %arg4[%c0_7, %c0_8] : memref<32x256xf32, #tpu.memory_space<vmem>>, vector<32x256xf32>
    %cst_9 = arith.constant dense<0.000000e+00> : vector<8x256xf32>
    %15 = tpu.matmul %13, %14, %cst_9 {dimension_numbers = #tpu.dot_dimension_numbers<[1], [0], [0], [1], [0, 0, 1, 1], [], []>} : vector<8x32xf32>, vector<32x256xf32>, vector<8x256xf32> -> vector<8x256xf32>
    %c0_10 = arith.constant 0 : index
    %c0_11 = arith.constant 0 : index
    %16 = vector.load %arg5[%c0_10, %c0_11] : memref<1x256xf32, #tpu.memory_space<vmem>>, vector<1x256xf32>
    %17 = vector.broadcast %16 : vector<1x256xf32> to vector<8x256xf32>
    %18 = arith.addf %15, %17 : vector<8x256xf32>
    %19 = vector.extract_strided_slice %18 {offsets = [0, 0], sizes = [8, 128], strides = [1, 1]} : vector<8x256xf32> to vector<8x128xf32>
    %cst_12 = arith.constant 5.000000e-01 : f32
    %20 = vector.broadcast %cst_12 : f32 to vector<8x128xf32>
    %21 = arith.mulf %20, %19 : vector<8x128xf32>
    %22 = math.tanh %21 : vector<8x128xf32>
    %cst_13 = arith.constant 1.000000e+00 : f32
    %23 = vector.broadcast %cst_13 : f32 to vector<8x128xf32>
    %24 = arith.addf %22, %23 : vector<8x128xf32>
    %cst_14 = arith.constant 5.000000e-01 : f32
    %25 = vector.broadcast %cst_14 : f32 to vector<8x128xf32>
    %26 = arith.mulf %25, %24 : vector<8x128xf32>
    %c0_15 = arith.constant 0 : index
    %c0_16 = arith.constant 0 : index
    %27 = vector.load %arg6[%c0_15, %c0_16] : memref<8x256xf32, #tpu.memory_space<vmem>>, vector<8x128xf32>
    tpu.vector_store %arg6[%c0_15, %c0_16], %26 {strides = array<i32>} : memref<8x256xf32, #tpu.memory_space<vmem>>, vector<8x128xf32>,
    %28 = vector.extract_strided_slice %18 {offsets = [0, 128], sizes = [8, 128], strides = [1, 1]} : vector<8x256xf32> to vector<8x128xf32>
    %cst_17 = arith.constant 0.000000e+00 : f32
    %29 = vector.broadcast %cst_17 : f32 to vector<8x128xf32>
    %30 = arith.maximumf %28, %29 : vector<8x128xf32>
    %31 = math.absf %28 : vector<8x128xf32>
    %cst_18 = arith.constant 0.000000e+00 : f32
    %32 = vector.broadcast %cst_18 : f32 to vector<8x128xf32>
    %33 = arith.subf %32, %31 : vector<8x128xf32>
    %34 = math.exp %33 : vector<8x128xf32>
    %35 = math.log1p %34 : vector<8x128xf32>
    %36 = arith.addf %30, %35 : vector<8x128xf32>
    %c0_19 = arith.constant 0 : index
    %c128 = arith.constant 128 : index
    %37 = vector.load %arg6[%c0_19, %c128] : memref<8x256xf32, #tpu.memory_space<vmem>>, vector<8x128xf32>
    tpu.vector_store %arg6[%c0_19, %c128], %36 {strides = array<i32>} : memref<8x256xf32, #tpu.memory_space<vmem>>, vector<8x128xf32>,
    return
  }
  func.func @transform_0(%arg0: i32) -> (i32, i32) {
    %c0_i32 = arith.constant 0 : i32
    %c0_i32_0 = arith.constant 0 : i32
    return %arg0, %c0_i32 : i32, i32
  }
  func.func @transform_1(%arg0: i32) -> (i32, i32) {
    %c0_i32 = arith.constant 0 : i32
    %c0_i32_0 = arith.constant 0 : i32
    %c0_i32_1 = arith.constant 0 : i32
    return %c0_i32, %c0_i32_0 : i32, i32
  }
  func.func @transform_2(%arg0: i32) -> (i32, i32) {
    %c0_i32 = arith.constant 0 : i32
    %c0_i32_0 = arith.constant 0 : i32
    %c0_i32_1 = arith.constant 0 : i32
    return %c0_i32, %c0_i32_0 : i32, i32
  }
  func.func @transform_3(%arg0: i32) -> (i32, i32) {
    %c0_i32 = arith.constant 0 : i32
    %c0_i32_0 = arith.constant 0 : i32
    %c0_i32_1 = arith.constant 0 : i32
    return %c0_i32, %c0_i32_0 : i32, i32
  }
  func.func @transform_4(%arg0: i32) -> (i32, i32) {
    %c0_i32 = arith.constant 0 : i32
    %c0_i32_0 = arith.constant 0 : i32
    %c0_i32_1 = arith.constant 0 : i32
    return %c0_i32, %c0_i32_0 : i32, i32
  }
  func.func @transform_5(%arg0: i32) -> (i32, i32) {
    %c0_i32 = arith.constant 0 : i32
    %c0_i32_0 = arith.constant 0 : i32
    return %arg0, %c0_i32 : i32, i32
  }
}

</mosaic_0001>

<bundles_post_ra>
// kernel: tpu_custom_call.1
= control target key start
LH: loop header
LB: loop body
LE: loop exit
PB: predicated region body
PF: predicated region fallthrough
CT: control target
= control target key end

     0   :  { %10 = vsyncpa [#allocation3], 0  ;;  %s382_s0 = inlined_call_operand.hbm [shape: f32[8,8], index: 0, kind: input, shape index: {}]   ;;  %s383_s1 = inlined_call_operand.hbm [shape: f32[8,32], index: 1, kind: input, shape index: {}]   ;;  %s384_s2 = inlined_call_operand.vmem [shape: f32[1,32], index: 2, kind: input, shape index: {}]   ;;  %s385_s3 = inlined_call_operand.hbm [shape: f32[32,256], index: 3, kind: input, shape index: {}]   ;;  %s386_s4 = inlined_call_operand.vmem [shape: f32[1,256], index: 4, kind: input, shape index: {}]   ;;  %s387_s5 = inlined_call_operand.hbm [shape: f32[8,256], index: 5, kind: output, shape index: {}]  }
   0x1   :  { %11 = vsyncpa [#allocation6], 0  ;;  %s29_s20 = sshll.u32 %s383_s1, 4  ;;  %s30_s20 = int_to_ptr.hbm [resolvable:$true] %s29_s20 }
   0x2   :  { %12 = vsyncpa [#allocation4], 0  ;;  %s328_s21 = smov [#allocation5]   ;;  %s18_s25 = sshll.u32 %s382_s0, 4  ;;  %s19_s25 = int_to_ptr.hbm [resolvable:$true] %s18_s25 }
   0x3   :  { %s31_s22 = sshll.u32 %s328_s21, 4  ;;  %s329_s26 = smov [#allocation2]   ;;  %s32_s22 = int_to_ptr.vmem [resolvable:$true] %s31_s22 }
   0x4   :  { %34 = dma.hbm_to_vmem [thread:$0]  %s30_s20, 128, %s32_s22, [#allocation6]  }
   0x5   :  { %s20_s27 = sshll.u32 %s329_s26, 4  ;;  %s41_s30 = sshll.u32 %s385_s3, 4  ;;  %s21_s27 = int_to_ptr.vmem [resolvable:$true] %s20_s27  ;;  %s42_s30 = int_to_ptr.hbm [resolvable:$true] %s41_s30 }
   0x6   :  { %23 = dma.hbm_to_vmem [thread:$0]  %s19_s25, 128, %s21_s27, [#allocation3]  }
   0x7   :  { %s330_s1 = smov [#allocation7]   ;;  %s331_s7 = smov 256  }
   0x8   :  { %s43_s6 = sshll.u32 %s330_s1, 4  ;;  %s332_s8 = smov 16   ;;  %s44_s6 = int_to_ptr.vmem [resolvable:$true] %s43_s6 }
   0x9   :  { %49 = dma.hbm_to_vmem [thread:$0]  %s42_s30, 1024, %s44_s6, [#allocation6], %s331_s7, %s331_s7, %s332_s8  }
   0xa   :  { %322 = dma.done.wait [#allocation3], 128  }
   0xb   :  { %323 = vsyncadd [#allocation3], 4294967168 }
   0xc   :  { %324 = dma.done.wait [#allocation6], 1152  }
   0xd   :  { %325 = vsyncadd [#allocation6], 4294966144  ;;  %vm70_vm0 = vcmask 64512   ;;  %v65_v0 = vld [vmem:[#allocation5] sm:$0xff]  ;;  %v64_v1 = vld [vmem:[#allocation2] sm:$0xff]  ;;  %vm123_vm2 = vcmask 261120  }
   0xe   :  { %89 = vmatpush.msra.mxu0 %v65_v0  ;;  %v115_v2 = vld [vmem:[#allocation7 + $0x30] sm:$0xff]  ;;  %v116_v3 = vld [vmem:[#allocation7 + $0x38] sm:$0xff]  ;;  %v113_v4 = vld [vmem:[#allocation7 + $0x20] sm:$0xff]  ;;  %s195_s13 = sshll.u32 %s387_s5, 4  ;;  %s196_s13 = int_to_ptr.hbm [resolvable:$true] %s195_s13 }
   0xf   :  { %206 = vmatmul.msk.f32.vlgmr.msra.gmra.mxu0 %vm70_vm0, %v64_v1  ;;  %139 = vmatpush.msra.mxu1 %v115_v2  ;;  %v114_v5 = vld [vmem:[#allocation7 + $0x28] sm:$0xff]  ;;  %v111_v6 = vld [vmem:[#allocation7 + $0x10] sm:$0xff]  ;;  %v112_v7 = vld [vmem:[#allocation7 + $0x18] sm:$0xff] }
  0x10   :  { %159 = vmatpush.msra.mxu2 %v116_v3  ;;  %v109_v8 = vld [vmem:[#allocation7] sm:$0xff]  ;;  %v110_v9 = vld [vmem:[#allocation7 + $0x8] sm:$0xff]  ;;  %v215_v10 = vld [vmem:[%s384_s2] ss:$0 sm:$0xff] }
  0x11   :  { %140 = vmatpush.msra.mxu1 %v113_v4  ;;  %v117_v27 = vld [vmem:[%s386_s4] sm:$0x3]  ;;  %s333_s4 = smov [#allocation8]  }
  0x12   :  { %160 = vmatpush.msra.mxu2 %v114_v5  ;;  %v119_v28 = vperm.slane %v117_v27, 0  ;;  %v120_v32 = vperm.slane %v117_v27, 1  ;;  %s193_s10 = sshll.u32 %s333_s4, 4  ;;  %s194_s10 = int_to_ptr.vmem [resolvable:$true] %s193_s10 }
  0x13   :  { %141 = vmatpush.msra.mxu1 %v111_v6 }
  0x14   :  { %161 = vmatpush.msra.mxu2 %v112_v7 }
  0x15   :  { %142 = vmatpush.msra.mxu1 %v109_v8 }
  0x16   :  { %162 = vmatpush.msra.mxu2 %v110_v9 }
  0x8c   :  { %v91_v11 = vpop.f32.mrf.mxu0 }
  0x8d   :  { %v92_v12 = vadd.f32 %v215_v10, %v91_v11 }
  0x8f   :  { %v95_v13 = vand.u32 2147483647, %v92_v12  ;;  %v94_v24 = vmax.f32 %v92_v12, 0.0 }
  0x91   :  { %v96_v14 = vsub.f32 0.0, %v95_v13 }
  0x93   :  { %v97_v15 = vmul.f32 1.442695, %v96_v14 }
  0x95   :  { %216 = vpow2.f32 %v97_v15 }
  0x9b   :  { %v217_v16 = vpop.eup %216 }
  0x9c   :  { %v99_v17 = vadd.f32 1.0, %v217_v16  ;;  %v102_v18 = vmul.f32 -0.5, %v217_v16  ;;  %v105_v20 = vand.u32 2147483647, %v217_v16 }
  0x9e   :  { %218 = vlog2.f32 %v99_v17  ;;  %v103_v19 = vadd.f32 1.0, %v102_v18  ;;  %vm106_vm1 = vcmp.lt.f32.partialorder %v105_v20, 0.0004427343 }
  0xa0   :  { %v104_v23 = vmul.f32 %v217_v16, %v103_v19 }
  0xa4   :  { %v219_v21 = vpop.eup %218 }
  0xa5   :  { %v101_v22 = vmul.f32 0.6931472, %v219_v21 }
  0xa7   :  { %v107_v25 = vsel %vm106_vm1, %v104_v23, %v101_v22 }
  0xa8   :  { %v108_v26 = vadd.f32 %v107_v25, %v94_v24 }
  0xaa   :  { %207 = vmatmul.msk.f32.vlgmr.msra.gmra.mxu1 %vm123_vm2, %v108_v26  ;;  %208 = vmatmul.msk.f32.vlgmr.msra.gmra.mxu2 %vm123_vm2, %v108_v26 }
 0x127   :  { %v144_v29 = vpop.f32.mrf.mxu1 }
 0x128   :  { %v145_v30 = vadd.f32 %v144_v29, %v119_v28 }
 0x12a   :  { %v167_v31 = vmul.f32 0.5, %v145_v30 }
 0x12c   :  { %220 = vtanh.f32 %v167_v31 }
 0x12d   :  { %v164_v33 = vpop.f32.mrf.mxu2 }
 0x12e   :  { %v165_v34 = vadd.f32 %v164_v33, %v120_v32 }
 0x130   :  { %v173_v35 = vand.u32 2147483647, %v165_v34  ;;  %v172_v49 = vmax.f32 %v165_v34, 0.0 }
 0x132   :  { %v221_v36 = vpop.eup %220  ;;  %v174_v37 = vsub.f32 0.0, %v173_v35 }
 0x133   :  { %v169_v38 = vadd.f32 1.0, %v221_v36 }
 0x134   :  { %v175_v39 = vmul.f32 1.442695, %v174_v37 }
 0x135   :  { %v170_v40 = vmul.f32 0.5, %v169_v38 }
 0x136   :  { %222 = vpow2.f32 %v175_v39 }
 0x137   :  { %171 = vst [vmem:[#allocation8] sm:$0xff] %v170_v40 }
 0x13c   :  { %v223_v41 = vpop.eup %222 }
 0x13d   :  { %v177_v42 = vadd.f32 1.0, %v223_v41  ;;  %v180_v43 = vmul.f32 -0.5, %v223_v41  ;;  %v183_v45 = vand.u32 2147483647, %v223_v41 }
 0x13f   :  { %224 = vlog2.f32 %v177_v42  ;;  %v181_v44 = vadd.f32 1.0, %v180_v43  ;;  %vm184_vm3 = vcmp.lt.f32.partialorder %v183_v45, 0.0004427343 }
 0x141   :  { %v182_v48 = vmul.f32 %v223_v41, %v181_v44 }
 0x145   :  { %v225_v46 = vpop.eup %224 }
 0x146   :  { %v179_v47 = vmul.f32 0.6931472, %v225_v46 }
 0x148   :  { %v185_v50 = vsel %vm184_vm3, %v182_v48, %v179_v47 }
 0x149   :  { %v186_v51 = vadd.f32 %v185_v50, %v172_v49 }
 0x14b   :  { %187 = vst [vmem:[#allocation8 + $0x8] sm:$0xff] %v186_v51 }
 0x14c   :  { %198 = dma.vmem_to_hbm [thread:$0]  %s194_s10, 256, %s196_s13, [#allocation4]  }
 0x14d   :  { %326 = dma.done.wait [#allocation4], 256  }
 0x14e   :  { %327 = vsyncadd [#allocation4], 4294967040 }
 0x14f   :  { %203 = vsyncpa [#allocation3], 1 }
 0x150   :  { %204 = vsyncpa [#allocation6], 1 }
 0x151   :  { %205 = vsyncpa [#allocation4], 1 }

</bundles_post_ra>
